<compile_context>
chip_gen: v7x
topology: tpu7x:2x2x1
jax: 0.10.0
libtpu: 0.0.40
codegen_flags: <defaults>
</compile_context>

<pallas_src>
import functools

import jax
import jax.numpy as jnp
import numpy as np
from jax.experimental import pallas as pl
from jax.experimental.pallas import tpu as pltpu

LRELU_SLOPE = 0.1
BN_EPS = 1e-5


def _lrelu(z):
    return jnp.where(z > 0, z, LRELU_SLOPE * z)


def _const_spec(shape, grid_rank):
    zeros = (0,) * len(shape)
    if grid_rank == 1:
        return pl.BlockSpec(shape, lambda i: zeros)
    return pl.BlockSpec(shape, lambda i, j: zeros)


# ---------------------------------------------------------------------------
# pass 1: down-scaling Linear + residual Linear + per-tile BN partial sums
# ---------------------------------------------------------------------------
def _linear_stats_kernel(feats_ref, w_down_ref, w_res_ref,
                         x_raw_ref, r_raw_ref,
                         x_sum_ref, x_sq_ref, r_sum_ref, r_sq_ref):
    f = feats_ref[...]                                                    # [IN, Tn]
    x = jnp.dot(w_down_ref[...], f, preferred_element_type=jnp.float32)   # [MID, Tn]
    r = jnp.dot(w_res_ref[...], f, preferred_element_type=jnp.float32)    # [OUT, Tn]
    x_raw_ref[...] = x
    r_raw_ref[...] = r
    x_sum_ref[...] = jnp.sum(x, axis=1, keepdims=True)[None]              # [1, MID, 1]
    x_sq_ref[...] = jnp.sum(x * x, axis=1, keepdims=True)[None]
    r_sum_ref[...] = jnp.sum(r, axis=1, keepdims=True)[None]
    r_sq_ref[...] = jnp.sum(r * r, axis=1, keepdims=True)[None]


# ---------------------------------------------------------------------------
# pass 2: KPConv over the dense complete graph, tiled (dst 'parallel', src 'arbitrary')
# ---------------------------------------------------------------------------
def _kpconv_kernel(pos_src_ref, pos_dst_ref, x_raw_ref,
                   w_stack_ref, x_scale_ref, x_shift_ref,
                   ht_ref, h_sum_ref, h_sq_ref,
                   *, kernel_points, extent, mid):
    s = pl.program_id(1)

    @pl.when(s == 0)
    def _():
        ht_ref[...] = jnp.zeros_like(ht_ref)

    # BN + LeakyReLU of the down-scaled features for this src tile (global stats from
    # pass 1; recomputing per (dst, src) step is O(MID*Ts), negligible vs the k loop).
    xt = _lrelu(x_raw_ref[...] * x_scale_ref[...] + x_shift_ref[...])     # [MID, Ts]
    # Stacked per-kernel-point projections: y[k*MID:(k+1)*MID, :] = (W_k^T / extent) @ xt
    y = jnp.dot(w_stack_ref[...], xt, preferred_element_type=jnp.float32)  # [K*MID, Ts]

    num_k, p_dim = kernel_points.shape
    src_cols = [pos_src_ref[:, p:p + 1] for p in range(p_dim)]            # each [Ts, 1]
    dst_rows = [pos_dst_ref[p:p + 1, :] for p in range(p_dim)]            # each [1, Td]

    # k-independent squared pairwise distance; diffs consumed immediately, only `base`
    # stays live across the kernel-point loop.
    base = None
    for p in range(p_dim):
        d = src_cols[p] - dst_rows[p]                                     # [Ts, Td]
        base = d * d if base is None else base + d * d

    acc = ht_ref[...]                                                     # [MID, Td]
    # K is small & static -> unrolled; kernel-point coordinates are baked-in immediates.
    for k in range(num_k):
        kp = [float(kernel_points[k, p]) for p in range(p_dim)]
        kp_sq = sum(c * c for c in kp)
        col = kp_sq - 2.0 * sum(c * src_cols[p] for p, c in enumerate(kp))  # [Ts, 1]
        row = 2.0 * sum(c * dst_rows[p] for p, c in enumerate(kp))          # [1, Td]
        d2 = jnp.maximum(base + col + row, 0.0)    # clamp: guard against cancellation
        m = jnp.maximum(extent - jnp.sqrt(d2), 0.0)  # [Ts, Td]; 1/extent folded in w_stack
        # TODO(synk): bf16-cast y/m here for v6e/v7x MXU throughput (kept f32 for 1e-4).
        acc = acc + jnp.dot(y[k * mid:(k + 1) * mid, :], m,
                            preferred_element_type=jnp.float32)           # [MID, Td]
    ht_ref[...] = acc

    @pl.when(s == pl.num_programs(1) - 1)
    def _():
        h_sum_ref[...] = jnp.sum(acc, axis=1, keepdims=True)[None]        # [1, MID, 1]
        h_sq_ref[...] = jnp.sum(acc * acc, axis=1, keepdims=True)[None]


# ---------------------------------------------------------------------------
# pass 3: BN(ht) + LeakyReLU + up-scaling Linear + per-tile BN partial sums
# ---------------------------------------------------------------------------
def _up_stats_kernel(ht_raw_ref, w_up_ref, h_scale_ref, h_shift_ref,
                     u_raw_ref, u_sum_ref, u_sq_ref):
    h = _lrelu(ht_raw_ref[...] * h_scale_ref[...] + h_shift_ref[...])     # [MID, Tn]
    u = jnp.dot(w_up_ref[...], h, preferred_element_type=jnp.float32)     # [OUT, Tn]
    u_raw_ref[...] = u
    u_sum_ref[...] = jnp.sum(u, axis=1, keepdims=True)[None]              # [1, OUT, 1]
    u_sq_ref[...] = jnp.sum(u * u, axis=1, keepdims=True)[None]


# ---------------------------------------------------------------------------
# pass 4: BN(up) + LeakyReLU + BN(res) + add + final LeakyReLU
# ---------------------------------------------------------------------------
def _finalize_kernel(u_raw_ref, r_raw_ref, u_scale_ref, u_shift_ref,
                     r_scale_ref, r_shift_ref, o_ref):
    u = _lrelu(u_raw_ref[...] * u_scale_ref[...] + u_shift_ref[...])
    r = r_raw_ref[...] * r_scale_ref[...] + r_shift_ref[...]
    o_ref[...] = _lrelu(u + r)


# ---------------------------------------------------------------------------
# wrapper
# ---------------------------------------------------------------------------
def _bn_scale_shift(sum_parts, sq_parts, n, gamma_col, beta_col):
    """Training-mode BatchNorm1d (biased variance) folded to scale/shift columns."""
    total = jnp.sum(sum_parts, axis=0)                                    # [C, 1]
    total_sq = jnp.sum(sq_parts, axis=0)                                  # [C, 1]
    mean = total / n
    var = jnp.maximum(total_sq / n - mean * mean, 0.0)
    scale = gamma_col * jax.lax.rsqrt(var + BN_EPS)
    shift = beta_col - mean * scale
    return scale, shift


def _pick_tile(n, target):
    # Demo-simple: fall back to the full axis when `target` does not divide N.
    # TODO(synk): production should pad N to a 128/256-aligned multiple of the tile.
    return target if (target <= n and n % target == 0) else n


def resnet_bottleneck_block(pos, feats, params, *, tn=128, ts=128, td=128):
    """block_name='resnetb' (non-strided), dense complete graph, BN in training mode."""
    n = pos.shape[0]
    in_dim = feats.shape[1]
    mid = params["w_down"].shape[1]
    out_dim = params["w_up"].shape[1]
    num_k = params["w_kp"].shape[0]
    kp_np = np.asarray(params["kernel_points"], dtype=np.float32)
    p_dim = kp_np.shape[1]
    extent = float(params["kp_extent"])
    f32 = jnp.float32

    tn = _pick_tile(n, tn)
    ts = _pick_tile(n, ts)
    td = _pick_tile(n, td)
    n_tn, n_ts, n_td = n // tn, n // ts, n // td

    as_col = lambda v: jnp.reshape(v, (-1, 1)).astype(f32)

    # Layout glue (tiny one-time XLA ops). For stacked blocks, keep activations in [C,N].
    feats_t = jnp.transpose(feats)                                        # [IN, N]
    pos_t = jnp.transpose(pos)                                            # [P, N]
    w_down_t = jnp.transpose(params["w_down"])                            # [MID, IN]
    w_res_t = jnp.transpose(params["w_res"])                              # [OUT, IN]
    w_up_t = jnp.transpose(params["w_up"])                                # [OUT, MID]
    # Stacked KPConv weights with 1/extent folded in:
    #   w_stack[k*MID + d, c] = w_kp[k, c, d] / extent
    w_stack = (jnp.transpose(params["w_kp"], (0, 2, 1)).reshape(num_k * mid, mid)
               / extent).astype(f32)

    # ---- pass 1: down + residual linears + BN partials -------------------
    nd_spec = lambda c: pl.BlockSpec((c, tn), lambda j: (0, j))
    st_spec = lambda c: pl.BlockSpec((1, c, 1), lambda j: (j, 0, 0))
    x_raw, r_raw, x_sum, x_sq, r_sum, r_sq = pl.pallas_call(
        _linear_stats_kernel,
        out_shape=(jax.ShapeDtypeStruct((mid, n), f32),
                   jax.ShapeDtypeStruct((out_dim, n), f32),
                   jax.ShapeDtypeStruct((n_tn, mid, 1), f32),
                   jax.ShapeDtypeStruct((n_tn, mid, 1), f32),
                   jax.ShapeDtypeStruct((n_tn, out_dim, 1), f32),
                   jax.ShapeDtypeStruct((n_tn, out_dim, 1), f32)),
        grid=(n_tn,),
        in_specs=[pl.BlockSpec((in_dim, tn), lambda j: (0, j)),
                  _const_spec((mid, in_dim), 1),
                  _const_spec((out_dim, in_dim), 1)],
        out_specs=(nd_spec(mid), nd_spec(out_dim),
                   st_spec(mid), st_spec(mid), st_spec(out_dim), st_spec(out_dim)),
        compiler_params=pltpu.CompilerParams(dimension_semantics=("parallel",)),
    )(feats_t, w_down_t, w_res_t)

    x_scale, x_shift = _bn_scale_shift(x_sum, x_sq, n,
                                       as_col(params["g_down"]), as_col(params["b_down"]))
    r_scale, r_shift = _bn_scale_shift(r_sum, r_sq, n,
                                       as_col(params["g_res"]), as_col(params["b_res"]))

    # ---- pass 2: KPConv (the O(N^2 * K) part) -----------------------------
    kp_kernel = functools.partial(_kpconv_kernel, kernel_points=kp_np,
                                  extent=extent, mid=mid)
    ht_raw, h_sum, h_sq = pl.pallas_call(
        kp_kernel,
        out_shape=(jax.ShapeDtypeStruct((mid, n), f32),
                   jax.ShapeDtypeStruct((n_td, mid, 1), f32),
                   jax.ShapeDtypeStruct((n_td, mid, 1), f32)),
        grid=(n_td, n_ts),                 # dst tiles ('parallel'), src tiles (reduction, last)
        in_specs=[pl.BlockSpec((ts, p_dim), lambda j, s: (s, 0)),    # pos: src rows
                  pl.BlockSpec((p_dim, td), lambda j, s: (0, j)),    # pos_t: dst lanes
                  pl.BlockSpec((mid, ts), lambda j, s: (0, s)),      # x_raw: src columns
                  _const_spec((num_k * mid, mid), 2),
                  _const_spec((mid, 1), 2),
                  _const_spec((mid, 1), 2)],
        out_specs=(pl.BlockSpec((mid, td), lambda j, s: (0, j)),     # accumulator across s
                   pl.BlockSpec((1, mid, 1), lambda j, s: (j, 0, 0)),
                   pl.BlockSpec((1, mid, 1), lambda j, s: (j, 0, 0))),
        compiler_params=pltpu.CompilerParams(
            dimension_semantics=("parallel", "arbitrary"),
            # 48 MiB is safe on v5e/v6e/v7x; raise toward ~96-112 MiB on v6e for big tiles.
            vmem_limit_bytes=48 * 1024 * 1024),
    )(pos, pos_t, x_raw, w_stack, x_scale, x_shift)

    h_scale, h_shift = _bn_scale_shift(h_sum, h_sq, n,
                                       as_col(params["g_kp"]), as_col(params["b_kp"]))

    # ---- pass 3: BN(ht) + lrelu + up-scaling linear + BN partials ---------
    u_raw, u_sum, u_sq = pl.pallas_call(
        _up_stats_kernel,
        out_shape=(jax.ShapeDtypeStruct((out_dim, n), f32),
                   jax.ShapeDtypeStruct((n_tn, out_dim, 1), f32),
                   jax.ShapeDtypeStruct((n_tn, out_dim, 1), f32)),
        grid=(n_tn,),
        in_specs=[pl.BlockSpec((mid, tn), lambda j: (0, j)),
                  _const_spec((out_dim, mid), 1),
                  _const_spec((mid, 1), 1),
                  _const_spec((mid, 1), 1)],
        out_specs=(nd_spec(out_dim), st_spec(out_dim), st_spec(out_dim)),
        compiler_params=pltpu.CompilerParams(dimension_semantics=("parallel",)),
    )(ht_raw, w_up_t, h_scale, h_shift)

    u_scale, u_shift = _bn_scale_shift(u_sum, u_sq, n,
                                       as_col(params["g_up"]), as_col(params["b_up"]))

    # ---- pass 4: final BNs + residual add + LeakyReLU ----------------------
    out_t = pl.pallas_call(
        _finalize_kernel,
        out_shape=jax.ShapeDtypeStruct((out_dim, n), f32),
        grid=(n_tn,),
        in_specs=[nd_spec(out_dim), nd_spec(out_dim),
                  _const_spec((out_dim, 1), 1), _const_spec((out_dim, 1), 1),
                  _const_spec((out_dim, 1), 1), _const_spec((out_dim, 1), 1)],
        out_specs=nd_spec(out_dim),
        compiler_params=pltpu.CompilerParams(dimension_semantics=("parallel",)),
    )(u_raw, r_raw, u_scale, u_shift, r_scale, r_shift)

    return jnp.transpose(out_t)                                           # [N, OUT]


# ---------------------------------------------------------------------------
# pure-JAX reference (for correctness check)
# ---------------------------------------------------------------------------
def reference(pos, feats, params):
    def bn(y, g, b):
        mean = jnp.mean(y, axis=0, keepdims=True)
        var = jnp.mean((y - mean) ** 2, axis=0, keepdims=True)
        return (y - mean) / jnp.sqrt(var + BN_EPS) * g + b

    def lrelu(z):
        return jnp.where(z > 0, z, LRELU_SLOPE * z)

    with jax.default_matmul_precision("highest"):
        shortcut = feats
        x = lrelu(bn(feats @ params["w_down"], params["g_down"], params["b_down"]))
        diff = pos[None, :, :] - pos[:, None, :]                          # [dst, src, P]
        y = diff[:, :, None, :] - params["kernel_points"][None, None]     # [dst, src, K, P]
        m = jnp.maximum(1.0 - jnp.sqrt(jnp.sum(y * y, -1)) / params["kp_extent"], 0.0)
        weighted = jnp.einsum("jik,ic->kjc", m, x)                        # [K, dst, C]
        h = jnp.einsum("kjc,kcd->jd", weighted, params["w_kp"])           # [dst, C_out]
        x = lrelu(bn(h, params["g_kp"], params["b_kp"]))
        res = bn(shortcut @ params["w_res"], params["g_res"], params["b_res"])
        up = lrelu(bn(x @ params["w_up"], params["g_up"], params["b_up"]))
        return lrelu(up + res)


# ---------------------------------------------------------------------------
# main
# ---------------------------------------------------------------------------
if __name__ == "__main__":
    # Small-but-tiled demo: N=256 nodes with 128-node tiles exercises the 2x2
    # (dst, src) KPConv grid, the cross-src-tile accumulator and the two-pass BN.
    N = 256
    IN_DIM = 16
    OUT_DIM = 32
    MID = OUT_DIM // 4           # 8
    K = 15                       # num_kernel_points
    P_DIM = 3
    RADIUS = 1.0
    KP_EXTENT_CFG = 1.2
    CONV_RADIUS = 2.5
    kp_extent = RADIUS * KP_EXTENT_CFG / CONV_RADIUS   # current_extent

    key = jax.random.PRNGKey(0)
    k_pos, k_feat, k_wd, k_wkp, k_wup, k_wres, k_kp = jax.random.split(key, 7)

    pos = jax.random.uniform(k_pos, (N, P_DIM), jnp.float32, -0.3, 0.3)
    feats = jax.random.normal(k_feat, (N, IN_DIM), jnp.float32)

    def unif(k, shape, fan_in):
        b = 1.0 / np.sqrt(fan_in)
        return jax.random.uniform(k, shape, jnp.float32, -b, b)

    # TODO(synk): load_kernels() uses KPConv's optimized kernel dispositions; synthetic
    # deterministic kernel points are used here (center point fixed at the origin).
    kp_rand = jax.random.uniform(k_kp, (K, P_DIM), jnp.float32, -RADIUS, RADIUS)
    kernel_points = kp_rand.at[0].set(0.0)

    params = dict(
        w_down=unif(k_wd, (IN_DIM, MID), IN_DIM),
        g_down=jnp.ones((1, MID), jnp.float32), b_down=jnp.zeros((1, MID), jnp.float32),
        w_kp=unif(k_wkp, (K, MID, MID), MID * MID),
        kernel_points=kernel_points, kp_extent=kp_extent,
        g_kp=jnp.ones((1, MID), jnp.float32), b_kp=jnp.zeros((1, MID), jnp.float32),
        w_up=unif(k_wup, (MID, OUT_DIM), MID),
        g_up=jnp.ones((1, OUT_DIM), jnp.float32), b_up=jnp.zeros((1, OUT_DIM), jnp.float32),
        w_res=unif(k_wres, (IN_DIM, OUT_DIM), IN_DIM),
        g_res=jnp.ones((1, OUT_DIM), jnp.float32), b_res=jnp.zeros((1, OUT_DIM), jnp.float32),
    )

    out = resnet_bottleneck_block(pos, feats, params)   # default 128 tiles -> 2x2 KP grid
    out = jax.block_until_ready(out)

    ref = jax.block_until_ready(reference(pos, feats, params))
    assert out.shape == (N, OUT_DIM) and out.dtype == jnp.float32
    np.testing.assert_allclose(np.asarray(out), np.asarray(ref), rtol=1e-4, atol=1e-4)

    print("KERNEL_OK")
</pallas_src>

<mosaic_0001>
module attributes {stable_mosaic.version = 11 : i64} {
  func.func @_linear_stats_kernel(%arg0: i32, %arg1: memref<16x128xf32, #tpu.memory_space<vmem>>, %arg2: memref<8x16xf32, #tpu.memory_space<vmem>>, %arg3: memref<32x16xf32, #tpu.memory_space<vmem>>, %arg4: memref<8x128xf32, #tpu.memory_space<vmem>>, %arg5: memref<32x128xf32, #tpu.memory_space<vmem>>, %arg6: memref<1x8x1xf32, #tpu.memory_space<vmem>>, %arg7: memref<1x8x1xf32, #tpu.memory_space<vmem>>, %arg8: memref<1x32x1xf32, #tpu.memory_space<vmem>>, %arg9: memref<1x32x1xf32, #tpu.memory_space<vmem>>) attributes {dimension_semantics = [#tpu.dimension_semantics<parallel>], iteration_bounds = array<i64: 2>, scalar_prefetch = 0 : i64, scratch_operands = 0 : i64, tpu.core_type = #tpu.core_type<tc>, window_params = [{transform_indices = @transform_0, window_bounds = array<i64: 16, 128>}, {pipeline_mode = #tpu.pipeline_mode<synchronous>, transform_indices = @transform_1, window_bounds = array<i64: 8, 16>}, {pipeline_mode = #tpu.pipeline_mode<synchronous>, transform_indices = @transform_2, window_bounds = array<i64: 32, 16>}, {transform_indices = @transform_3, window_bounds = array<i64: 8, 128>}, {transform_indices = @transform_4, window_bounds = array<i64: 32, 128>}, {transform_indices = @transform_5, window_bounds = array<i64: 1, 8, 1>}, {transform_indices = @transform_6, window_bounds = array<i64: 1, 8, 1>}, {transform_indices = @transform_7, window_bounds = array<i64: 1, 32, 1>}, {transform_indices = @transform_8, window_bounds = array<i64: 1, 32, 1>}]} {
    %c0 = arith.constant 0 : index
    %c0_0 = arith.constant 0 : index
    %0 = vector.load %arg1[%c0, %c0_0] : memref<16x128xf32, #tpu.memory_space<vmem>>, vector<16x128xf32>
    %c0_1 = arith.constant 0 : index
    %c0_2 = arith.constant 0 : index
    %1 = vector.load %arg2[%c0_1, %c0_2] : memref<8x16xf32, #tpu.memory_space<vmem>>, vector<8x16xf32>
    %cst = arith.constant dense<0.000000e+00> : vector<8x128xf32>
    %2 = tpu.matmul %1, %0, %cst {dimension_numbers = #tpu.dot_dimension_numbers<[1], [0], [0], [1], [0, 0, 1, 1], [], []>} : vector<8x16xf32>, vector<16x128xf32>, vector<8x128xf32> -> vector<8x128xf32>
    %c0_3 = arith.constant 0 : index
    %c0_4 = arith.constant 0 : index
    %3 = vector.load %arg3[%c0_3, %c0_4] : memref<32x16xf32, #tpu.memory_space<vmem>>, vector<32x16xf32>
    %cst_5 = arith.constant dense<0.000000e+00> : vector<32x128xf32>
    %4 = tpu.matmul %3, %0, %cst_5 {dimension_numbers = #tpu.dot_dimension_numbers<[1], [0], [0], [1], [0, 0, 1, 1], [], []>} : vector<32x16xf32>, vector<16x128xf32>, vector<32x128xf32> -> vector<32x128xf32>
    %c0_6 = arith.constant 0 : index
    %c0_7 = arith.constant 0 : index
    %5 = vector.load %arg4[%c0_6, %c0_7] : memref<8x128xf32, #tpu.memory_space<vmem>>, vector<8x128xf32>
    tpu.vector_store %arg4[%c0_6, %c0_7], %2 {strides = array<i32>} : memref<8x128xf32, #tpu.memory_space<vmem>>, vector<8x128xf32>,
    %c0_8 = arith.constant 0 : index
    %c0_9 = arith.constant 0 : index
    %6 = vector.load %arg5[%c0_8, %c0_9] : memref<32x128xf32, #tpu.memory_space<vmem>>, vector<32x128xf32>
    tpu.vector_store %arg5[%c0_8, %c0_9], %4 {strides = array<i32>} : memref<32x128xf32, #tpu.memory_space<vmem>>, vector<32x128xf32>,
    %cst_10 = arith.constant dense<0.000000e+00> : vector<8xf32>
    %7 = vector.multi_reduction <add>, %2, %cst_10 [1] : vector<8x128xf32> to vector<8xf32>
    %8 = vector.shape_cast %7 : vector<8xf32> to vector<8x1xf32>
    %9 = vector.shape_cast %8 : vector<8x1xf32> to vector<1x8x1xf32>
    %c0_11 = arith.constant 0 : index
    %c0_12 = arith.constant 0 : index
    %c0_13 = arith.constant 0 : index
    %10 = vector.load %arg6[%c0_11, %c0_12, %c0_13] : memref<1x8x1xf32, #tpu.memory_space<vmem>>, vector<1x8x1xf32>
    tpu.vector_store %arg6[%c0_11, %c0_12, %c0_13], %9 {strides = array<i32>} : memref<1x8x1xf32, #tpu.memory_space<vmem>>, vector<1x8x1xf32>,
    %11 = arith.mulf %2, %2 : vector<8x128xf32>
    %cst_14 = arith.constant dense<0.000000e+00> : vector<8xf32>
    %12 = vector.multi_reduction <add>, %11, %cst_14 [1] : vector<8x128xf32> to vector<8xf32>
    %13 = vector.shape_cast %12 : vector<8xf32> to vector<8x1xf32>
    %14 = vector.shape_cast %13 : vector<8x1xf32> to vector<1x8x1xf32>
    %c0_15 = arith.constant 0 : index
    %c0_16 = arith.constant 0 : index
    %c0_17 = arith.constant 0 : index
    %15 = vector.load %arg7[%c0_15, %c0_16, %c0_17] : memref<1x8x1xf32, #tpu.memory_space<vmem>>, vector<1x8x1xf32>
    tpu.vector_store %arg7[%c0_15, %c0_16, %c0_17], %14 {strides = array<i32>} : memref<1x8x1xf32, #tpu.memory_space<vmem>>, vector<1x8x1xf32>,
    %cst_18 = arith.constant dense<0.000000e+00> : vector<32xf32>
    %16 = vector.multi_reduction <add>, %4, %cst_18 [1] : vector<32x128xf32> to vector<32xf32>
    %17 = vector.shape_cast %16 : vector<32xf32> to vector<32x1xf32>
    %18 = vector.shape_cast %17 : vector<32x1xf32> to vector<1x32x1xf32>
    %c0_19 = arith.constant 0 : index
    %c0_20 = arith.constant 0 : index
    %c0_21 = arith.constant 0 : index
    %19 = vector.load %arg8[%c0_19, %c0_20, %c0_21] : memref<1x32x1xf32, #tpu.memory_space<vmem>>, vector<1x32x1xf32>
    tpu.vector_store %arg8[%c0_19, %c0_20, %c0_21], %18 {strides = array<i32>} : memref<1x32x1xf32, #tpu.memory_space<vmem>>, vector<1x32x1xf32>,
    %20 = arith.mulf %4, %4 : vector<32x128xf32>
    %cst_22 = arith.constant dense<0.000000e+00> : vector<32xf32>
    %21 = vector.multi_reduction <add>, %20, %cst_22 [1] : vector<32x128xf32> to vector<32xf32>
    %22 = vector.shape_cast %21 : vector<32xf32> to vector<32x1xf32>
    %23 = vector.shape_cast %22 : vector<32x1xf32> to vector<1x32x1xf32>
    %c0_23 = arith.constant 0 : index
    %c0_24 = arith.constant 0 : index
    %c0_25 = arith.constant 0 : index
    %24 = vector.load %arg9[%c0_23, %c0_24, %c0_25] : memref<1x32x1xf32, #tpu.memory_space<vmem>>, vector<1x32x1xf32>
    tpu.vector_store %arg9[%c0_23, %c0_24, %c0_25], %23 {strides = array<i32>} : memref<1x32x1xf32, #tpu.memory_space<vmem>>, vector<1x32x1xf32>,
    return
  }
  func.func @transform_0(%arg0: i32) -> (i32, i32) {
    %c0_i32 = arith.constant 0 : i32
    %c0_i32_0 = arith.constant 0 : i32
    return %c0_i32, %arg0 : i32, i32
  }
  func.func @transform_1(%arg0: i32) -> (i32, i32) {
    %c0_i32 = arith.constant 0 : i32
    %c0_i32_0 = arith.constant 0 : i32
    %c0_i32_1 = arith.constant 0 : i32
    return %c0_i32, %c0_i32_0 : i32, i32
  }
  func.func @transform_2(%arg0: i32) -> (i32, i32) {
    %c0_i32 = arith.constant 0 : i32
    %c0_i32_0 = arith.constant 0 : i32
    %c0_i32_1 = arith.constant 0 : i32
    return %c0_i32, %c0_i32_0 : i32, i32
  }
  func.func @transform_3(%arg0: i32) -> (i32, i32) {
    %c0_i32 = arith.constant 0 : i32
    %c0_i32_0 = arith.constant 0 : i32
    return %c0_i32, %arg0 : i32, i32
  }
  func.func @transform_4(%arg0: i32) -> (i32, i32) {
    %c0_i32 = arith.constant 0 : i32
    %c0_i32_0 = arith.constant 0 : i32
    return %c0_i32, %arg0 : i32, i32
  }
  func.func @transform_5(%arg0: i32) -> (i32, i32, i32) {
    %c0_i32 = arith.constant 0 : i32
    %c0_i32_0 = arith.constant 0 : i32
    %c0_i32_1 = arith.constant 0 : i32
    return %arg0, %c0_i32, %c0_i32_0 : i32, i32, i32
  }
  func.func @transform_6(%arg0: i32) -> (i32, i32, i32) {
    %c0_i32 = arith.constant 0 : i32
    %c0_i32_0 = arith.constant 0 : i32
    %c0_i32_1 = arith.constant 0 : i32
    return %arg0, %c0_i32, %c0_i32_0 : i32, i32, i32
  }
  func.func @transform_7(%arg0: i32) -> (i32, i32, i32) {
    %c0_i32 = arith.constant 0 : i32
    %c0_i32_0 = arith.constant 0 : i32
    %c0_i32_1 = arith.constant 0 : i32
    return %arg0, %c0_i32, %c0_i32_0 : i32, i32, i32
  }
  func.func @transform_8(%arg0: i32) -> (i32, i32, i32) {
    %c0_i32 = arith.constant 0 : i32
    %c0_i32_0 = arith.constant 0 : i32
    %c0_i32_1 = arith.constant 0 : i32
    return %arg0, %c0_i32, %c0_i32_0 : i32, i32, i32
  }
}

</mosaic_0001>

<bundles_post_ra>
// kernel: tpu_custom_call.1
= control target key start
LH: loop header
LB: loop body
LE: loop exit
PB: predicated region body
PF: predicated region fallthrough
CT: control target
= control target key end

     0   :  { %s1321_s0 = inlined_call_operand.vmem [shape: f32[16,256], index: 0, kind: input, shape index: {}]   ;;  %s1322_s1 = inlined_call_operand.vmem [shape: f32[8,16], index: 1, kind: input, shape index: {}]   ;;  %s1323_s2 = inlined_call_operand.vmem [shape: f32[32,16], index: 2, kind: input, shape index: {}]   ;;  %s1324_s3 = inlined_call_operand.hbm [shape: f32[8,256], index: 3, kind: output, shape index: {0}]   ;;  %s1325_s4 = inlined_call_operand.hbm [shape: f32[32,256], index: 4, kind: output, shape index: {1}]   ;;  %s1326_s5 = inlined_call_operand.vmem [shape: f32[2,8,1], index: 5, kind: output, shape index: {2}]   ;;  %s1327_s6 = inlined_call_operand.vmem [shape: f32[2,8,1], index: 6, kind: output, shape index: {3}]   ;;  %s1328_s7 = inlined_call_operand.vmem [shape: f32[2,32,1], index: 7, kind: output, shape index: {4}]   ;;  %s1329_s8 = inlined_call_operand.vmem [shape: f32[2,32,1], index: 8, kind: output, shape index: {5}]  }
   0x1   :  { %1330 = sst [smem:[#allocation9_spill]] %s1321_s0 }
   0x2   :  { %1331 = sst [smem:[#allocation10_spill]] %s1322_s1 }
   0x3   :  { %14 = vsyncpa [#allocation4], 0 }
   0x4   :  { %16 = vsyncpa [#allocation4 + $0x1], 0 }
   0x5   :  { %17 = vsyncpa [#allocation6], 0 }
   0x6   :  { %19 = vsyncpa [#allocation6 + $0x1], 0  ;;  %s1135_s27 = smov 0   ;;  %s1137_s28 = smov 0  }
   0x7   :  { %s1139_s29 = smov 0   ;;  %s1141_s30 = smov 0  }
   0x8 LB: > { %s1156_s9 = sadd.s32 4294967295, %s1080_s30   ;;  %s875_s10 = sadd.s32 4294967294, %s1080_s30   ;;  %s1080_s30 = sphi %s1141_s30, %s1339_s30   ;;  %s1076_s29 = sphi %s1139_s29, %s1338_s29   ;;  %s1072_s28 = sphi %s1137_s28, %s1337_s28   ;;  %s1068_s27 = sphi %s1135_s27, %s1336_s27  }
   0x9   : > { %s1160_s11 = sadd.s32 1, %s1080_s30   ;;  %s32_s12 = sadd.s32 1, %s1076_s29 }
   0xa   : > { %s29_s13 = ssub.s32 %s1080_s30, %s1160_s11  ;;  %p39_p0 = scmp.ne.s32.totalorder %s1076_s29, %s1072_s28 }
   0xb   : > { %p30_p1 = scmp.eq.s32.totalorder %s29_s13, 0  ;;  %p40_p2 = scmp.eq.s32.totalorder %s1080_s30, 0 }
   0xc   : > { %p111_p3 = scmp.eq.s32.totalorder %s1156_s9, 1  ;;  %p116_p4 = scmp.ne.s32.totalorder %s1072_s28, %s1068_s27 }
   0xd   : > { %s1172_s14 = scalar_select %p30_p1, %s1076_s29, %s32_s12  }
   0xe   : > { %p41_p5 = por %p40_p2, %p39_p0  ;;  %p1174_p6 = por %p111_p3, %p39_p0 }
   0xf   : > { %p117_p7 = scmp.eq.s32.totalorder %s875_s10, 1  ;;  %p877_p9 = scmp.ge.s32.totalorder %s1080_s30, 2 }
  0x11   : > { %p1178_p8 = por %p117_p7, %p116_p4  ;;  %269 = sbr.rel (%p877_p9) target bundleno = 35 (0x23), region = 24 }
  0x18   : > { %272 = sbr.rel (!%p41_p5) target bundleno = 35 (0x23), region = 28  ;;  %s274_s17 = sand.u32 (%p41_p5), 1, %s1076_s29  }
  0x19   : > { %s879_s18 = sshll.u32 (%p41_p5), %s1080_s30, 3  ;;  %s878_s19 = sshll.u32 (%p41_p5), %s274_s17, 4 }
  0x1a   : > { %s1334_s0 = sld [smem:[#allocation9_spill]] (%p41_p5)  ;;  %s276_s23 = scalar_lea.vmem (%p41_p5), [#allocation2], %s878_s19 }
  0x20   : > { %s278_s22 = scalar_lea.vmem %s1334_s0, %s879_s18 }
  0x21   : > { %v308_v0 = vld [vmem:[%s278_s22] sm:$0xff]  ;;  %v310_v1 = vld [vmem:[%s278_s22 + $0x10] sm:$0xff] }
  0x22   : > { %309 = vst [vmem:[%s276_s23] sm:$0xff] %v308_v0  ;;  %311 = vst [vmem:[%s276_s23 + $0x8] sm:$0xff] %v310_v1 }
  0x23 PF: > { %p880_p10 = scmp.ge.s32.totalorder %s1080_s30, 1  ;;  %p316_p11 = scmp.lt.s32.totalorder %s1080_s30, 3 }
  0x25   : > { %p317_p12 = pnand %p880_p10, %p316_p11 }
  0x26   : > { %s1193_s24 = sand.u32 (!%p317_p12), 1, %s1072_s28   ;;  %vm400_vm0 = vcmask (!%p317_p12), 130048   ;;  %v1082_v2 = vmov (!%p317_p12), 0.0|0.0   ;;  %vm1083_vm1 = vmmov (!%p317_p12), 0   ;;  %v1084_v3 = vmov (!%p317_p12), 0.0   ;;  %v474_v4 = vld [vmem:[%s1323_s2] sm:$0xff] (!%p317_p12) }
  0x27   : > { %320 = sbr.rel (%p317_p12) target bundleno = 419 (0x1a3), region = 66  ;;  %929 = vmatprep.subr.bf16.mxu0 (!%p317_p12), %v1082_v2  ;;  %s881_s25 = sshll.u32 (!%p317_p12), %s1193_s24, 4  ;;  %916 = vmatprep.mubr.msk.f32.mxu0 (!%p317_p12), %vm1083_vm1, %v1084_v3  ;;  %v475_v9 = vld [vmem:[%s1323_s2 + $0x8] sm:$0xff] (!%p317_p12)  ;;  %v476_v10 = vld [vmem:[%s1323_s2 + $0x10] sm:$0xff] (!%p317_p12)  ;;  %v477_v11 = vld [vmem:[%s1323_s2 + $0x18] sm:$0xff] (!%p317_p12) }
  0x28   : > { %923 = vmatprep.mubr.msk.f32.mxu1 (!%p317_p12), %vm400_vm0, %v474_v4  ;;  %s325_s12 = scalar_lea.vmem (!%p317_p12), [#allocation2], %s881_s25  ;;  %s1335_s1 = sld [smem:[#allocation10_spill]] (!%p317_p12) }
  0x29   : > { %v397_v5 = vld [vmem:[%s325_s12] sm:$0xff] (!%p317_p12)  ;;  %v398_v6 = vld [vmem:[%s325_s12 + $0x8] sm:$0xff] (!%p317_p12)  ;;  %s882_s25 = sshll.u32 (!%p317_p12), %s1193_s24, 3  ;;  %s883_s26 = sshll.u32 (!%p317_p12), %s1193_s24, 5 }
  0x2a   : > { %v930_v7 = vpack.c.bf16 (!%p317_p12), %v398_v6, %v397_v5  ;;  %s345_s10 = scalar_lea.vmem (!%p317_p12), [#allocation3], %s882_s25  ;;  %s352_s12 = scalar_lea.vmem (!%p317_p12), [#allocation5], %s883_s26 }
  0x2b   : > { %s665_s13 = sshll.u32 (!%p317_p12), %s352_s12, 4  ;;  %s897_s17 = sshll.u32 (!%p317_p12), %s1156_s9, 7  ;;  %s1218_s13 = int_to_ptr.vmem [resolvable:$true] %s665_s13 }
  0x2c   : > { %931 = vmatpush3.bf16.msra.mxu0 (!%p317_p12), %v930_v7  ;;  %933 = vmatprep.subr.bf16.mxu1 (!%p317_p12), %v930_v7  ;;  %s653_s18 = sshll.u32 (!%p317_p12), %s345_s10, 4  ;;  %s1224_s21 = scalar_lea.hbm (!%p317_p12), %s1324_s3, %s897_s17  ;;  %s1226_s18 = int_to_ptr.vmem [resolvable:$true] %s653_s18 }
  0x2d   : > { %935 = vmatpush3.bf16.msra.mxu1 (!%p317_p12), %v930_v7  ;;  %s1231_s25 = scalar_lea.hbm (!%p317_p12), %s1325_s4, %s897_s17  ;;  %s617_s26 = scalar_lea.sflag (!%p317_p12), [#allocation4], %s1193_s24 }
  0x2e   : > { %v399_v8 = vld [vmem:[%s1335_s1] sm:$0xff] }
  0x2f   : > { %917 = vmatmul.mubr.msk.f32.vlgmr.msra.gmra.mrb[0].mxu0 %vm400_vm0, %v399_v8 }
  0x30   : > { %924 = vmatmul.mubr.msk.f32.vlgmr.msra.gmra.mrb[0].mxu1 %vm400_vm0, %v475_v9 }
  0x31   : > { %926 = vmatprep.mubr.msk.f32.mxu1 %vm400_vm0, %v476_v10 }
  0x34   : > { %927 = vmatmul.mubr.msk.f32.gmra.mrb[2].mxu1 %vm400_vm0, %v477_v11 }
 0x102   : > { %v470_v12 = vpop.f32.mrb[0].mxu0 }
 0x103   : > { %v925_v13 = vpop.f32.mrb[0].mxu1  ;;  %580 = vadd.xlane.f32.xlu0 %v470_v12  ;;  %v918_v14 = vpop.f32.mrb[1].mxu0  ;;  %v584_v15 = vmul.f32 %v470_v12, %v470_v12  ;;  %575 = vst [vmem:[%s345_s10] sm:$0xff] %v470_v12  ;;  %s1085_s10 = smov [#allocation3]  }
 0x104   : > { %577 = vst [vmem:[%s352_s12 + $0x8] sm:$0xff] %v925_v13  ;;  %590 = vadd.xlane.f32.xlu1 %v925_v13  ;;  %v556_v16 = vpop.f32.mrb[1].mxu1  ;;  %v601_v20 = vmul.f32 %v925_v13, %v925_v13  ;;  %s990_s19 = sshll.u32 %s1085_s10, 4  ;;  %s991_s19 = int_to_ptr.vmem [resolvable:$false] %s990_s19 }
 0x105   : > { %576 = vst [vmem:[%s352_s12] sm:$0xff] %v556_v16  ;;  %v600_v19 = vmul.f32 %v556_v16, %v556_v16  ;;  %s992_s20 = scalar_lea.vmem %s991_s19, 256  ;;  %p993_p2 = scmp.lt.s32.totalorder %s1226_s18, %s991_s19 }
 0x107   : > { %585 = vadd.xlane.f32.xlu0 %v584_v15  ;;  %v928_v17 = vpop.f32.mrb[2].mxu1 }
 0x108   : > { %588 = vadd.xlane.f32.xlu1 %v556_v16  ;;  %579 = vst [vmem:[%s352_s12 + $0x18] sm:$0xff] %v928_v17  ;;  %v566_v18 = vpop.f32.mrb[3].mxu1  ;;  %v603_v22 = vmul.f32 %v928_v17, %v928_v17 }
 0x109   : > { %578 = vst [vmem:[%s352_s12 + $0x10] sm:$0xff] %v566_v18  ;;  %v602_v21 = vmul.f32 %v566_v18, %v566_v18  ;;  %s986_s12 = scalar_lea.vmem %s1226_s18, 128 }
 0x10a   : > { %p987_p13 = scmp.ne.s32.totalorder %s1226_s18, %s986_s12  ;;  %p994_p3 = scmp.lt.s32.totalorder %s992_s20, %s986_s12 }
 0x10b   : > { %604 = vadd.xlane.f32.xlu0 %v600_v19 }
 0x10c   : > { %606 = vadd.xlane.f32.xlu1 %v601_v20  ;;  %p988_p0 = pnand %p987_p13, %p1174_p6  ;;  %p995_p4 = por %p994_p3, %p993_p2 }
 0x10e   : > { %p989_p1 = pneg %p988_p0 }
 0x10f   : > { %592 = vadd.xlane.f32.xlu0 %v566_v18 }
 0x110   : > { %594 = vadd.xlane.f32.xlu1 %v928_v17  ;;  %p996_p5 = pnand %p995_p4, %p989_p1 }
 0x113   : > { %608 = vadd.xlane.f32.xlu0 %v602_v21 }
 0x114   : > { %610 = vadd.xlane.f32.xlu1 %v603_v22 }
 0x115   : > { %999 = shalt.err (!%p996_p5)
}
 0x116   : > { %s1000_s17 = scalar_lea.hbm %s1224_s21, 128  ;;  %s1004_s10 = scalar_lea.hbm %s1324_s3, 256 }
 0x117   : > { %p1001_p7 = scmp.ne.s32.totalorder %s1224_s21, %s1000_s17  ;;  %p1005_p12 = scmp.lt.u32.totalorder %s1224_s21, %s1324_s3 }
 0x118   : > { %p1006_p13 = scmp.lt.u32.totalorder %s1004_s10, %s1000_s17  ;;  %p1008_p1 = scmp.lt.u32.totalorder %s1000_s17, %s1224_s21 }
 0x119   : > { %p1002_p10 = pnand %p1001_p7, %p1174_p6 }
 0x11a   : > { %p1007_p0 = por %p1006_p13, %p1005_p12 }
 0x11b   : > { %p1003_p11 = pneg %p1002_p10 }
 0x11c   : > { %p1009_p2 = por %p1008_p1, %p1007_p0 }
 0x11e   : > { %p1010_p3 = pnand %p1009_p2, %p1003_p11 }
 0x120   : > { %1013 = shalt.err (!%p1010_p3)
}
 0x121   : > { %936 = dma.vmem_to_hbm [thread:$0]  (%p1174_p6), %s1226_s18, 128, %s1224_s21, %s617_s26  }
 0x122   : > { %s622_s12 = scalar_lea.sflag [#allocation6], %s1193_s24  ;;  %s1014_s20 = scalar_lea.vmem %s1218_s13, 512 }
 0x123   : > { %p1015_p4 = scmp.ne.s32.totalorder %s1218_s13, %s1014_s20  ;;  %s1086_s0 = smov [#allocation5]  }
 0x124   : > { %s1018_s17 = sshll.u32 %s1086_s0, 4  ;;  %s1019_s17 = int_to_ptr.vmem [resolvable:$false] %s1018_s17 }
 0x125   : > { %p1016_p5 = pnand %p1015_p4, %p1174_p6  ;;  %s1020_s22 = scalar_lea.vmem %s1019_s17, 1024 }
 0x126   : > { %p1021_p10 = scmp.lt.s32.totalorder %s1218_s13, %s1019_s17  ;;  %p1022_p11 = scmp.lt.s32.totalorder %s1020_s22, %s1014_s20 }
 0x127   : > { %p1017_p7 = pneg %p1016_p5 }
 0x128   : > { %p1023_p12 = por %p1022_p11, %p1021_p10 }
 0x12a   : > { %p1024_p13 = pnand %p1023_p12, %p1017_p7 }
 0x12c   : > { %1027 = shalt.err (!%p1024_p13)
}
 0x12d   : > { %s1028_s18 = scalar_lea.hbm %s1231_s25, 512  ;;  %s1032_s23 = scalar_lea.hbm %s1325_s4, 1024 }
 0x12e   : > { %p1029_p0 = scmp.ne.s32.totalorder %s1231_s25, %s1028_s18  ;;  %p1033_p3 = scmp.lt.u32.totalorder %s1231_s25, %s1325_s4 }
 0x12f   : > { %p1034_p4 = scmp.lt.u32.totalorder %s1032_s23, %s1028_s18  ;;  %p1036_p7 = scmp.lt.u32.totalorder %s1028_s18, %s1231_s25 }
 0x130   : > { %p1030_p1 = pnand %p1029_p0, %p1174_p6 }
 0x131   : > { %p1035_p5 = por %p1034_p4, %p1033_p3 }
 0x132   : > { %p1031_p2 = pneg %p1030_p1 }
 0x133   : > { %p1037_p10 = por %p1036_p7, %p1035_p5 }
 0x135   : > { %p1038_p11 = pnand %p1037_p10, %p1031_p2 }
 0x137   : > { %1041 = shalt.err (!%p1038_p11)
}
 0x138   : > { %s1087_s20 = smov 128   ;;  %s1088_s0 = smov 256   ;;  %vm582_vm2 = vcmask 7168  }
 0x139   : > { %s1089_s17 = smov 8   ;;  %p379_p12 = scmp.lt.s32.totalorder %s1156_s9, 1 }
 0x13a   : > { %937 = dma.vmem_to_hbm [thread:$0]  (%p1174_p6), %s1218_s13, 512, %s1231_s25, %s622_s12, %s1087_s20, %s1088_s0, %s1089_s17  }
 0x13b   : > { %s1341_s9 = smov (!%p379_p12, %s1156_s9), 1 }
 0x13c   : > { %s884_s22 = sshll.u32 %s1341_s9, 3  ;;  %s901_s21 = sshll.u32 %s1341_s9, 5 }
 0x13d   : > { %s382_s23 = scalar_lea.vmem %s1326_s5, %s884_s22  ;;  %s391_s1 = scalar_lea.vmem %s1328_s7, %s901_s21 }
 0x13e   : > { %s386_s13 = scalar_lea.vmem %s1327_s6, %s884_s22  ;;  %s396_s12 = scalar_lea.vmem %s1329_s8, %s901_s21 }
 0x190   : > { %v581_v23 = vpop.xlane.xlu0 %580 }
 0x191   : > { %583 = vst.msk [vmem:[%s382_s23] sm:$0xff] %vm582_vm2, %v581_v23  ;;  %v591_v24 = vpop.xlane.xlu1 %590 }
 0x192   : > { %597 = vst.msk [vmem:[%s391_s1 + $0x8] sm:$0xff] %vm582_vm2, %v591_v24 }
 0x194   : > { %v586_v25 = vpop.xlane.xlu0 %585 }
 0x195   : > { %587 = vst.msk [vmem:[%s386_s13] sm:$0xff] %vm582_vm2, %v586_v25  ;;  %v589_v26 = vpop.xlane.xlu1 %588 }
 0x196   : > { %596 = vst.msk [vmem:[%s391_s1] sm:$0xff] %vm582_vm2, %v589_v26 }
 0x198   : > { %v605_v27 = vpop.xlane.xlu0 %604 }
 0x199   : > { %612 = vst.msk [vmem:[%s396_s12] sm:$0xff] %vm582_vm2, %v605_v27  ;;  %v607_v28 = vpop.xlane.xlu1 %606 }
 0x19a   : > { %613 = vst.msk [vmem:[%s396_s12 + $0x8] sm:$0xff] %vm582_vm2, %v607_v28 }
 0x19c   : > { %v593_v29 = vpop.xlane.xlu0 %592 }
 0x19d   : > { %598 = vst.msk [vmem:[%s391_s1 + $0x10] sm:$0xff] %vm582_vm2, %v593_v29  ;;  %v595_v30 = vpop.xlane.xlu1 %594 }
 0x19e   : > { %599 = vst.msk [vmem:[%s391_s1 + $0x18] sm:$0xff] %vm582_vm2, %v595_v30 }
 0x1a0   : > { %v609_v31 = vpop.xlane.xlu0 %608 }
 0x1a1   : > { %614 = vst.msk [vmem:[%s396_s12 + $0x10] sm:$0xff] %vm582_vm2, %v609_v31  ;;  %v611_v32 = vpop.xlane.xlu1 %610 }
 0x1a2   : > { %615 = vst.msk [vmem:[%s396_s12 + $0x18] sm:$0xff] %vm582_vm2, %v611_v32 }
 0x1a3 PF: > { %s692_s20 = sand.u32 1, %s1068_s27   ;;  %p941_p6 = pnand %p877_p9, %p1178_p8 }
 0x1a4   : > { %s693_s0 = scalar_lea.sflag [#allocation4], %s692_s20 }
 0x1a5   : > { %1059 = dma.done.wait (!%p941_p6), %s693_s0, 128  }
 0x1a6   : > { %1061 = vsyncadd (!%p941_p6), %s693_s0, 4294967168  ;;  %s702_s17 = scalar_lea.sflag [#allocation6], %s692_s20 }
 0x1a7   : > { %1063 = dma.done.wait (!%p941_p6), %s702_s17, 512  }
 0x1a8   : > { %1065 = vsyncadd (!%p941_p6), %s702_s17, 4294966784  ;;  %p22_p13 = scmp.ge.s32.totalorder %s1160_s11, 4   ;;  %s1336_s27 = smov %s1072_s28 }
 0x1a9   : > { %s1337_s28 = smov %s1076_s29  ;;  %s1338_s29 = smov %s1172_s14 }
 0x1aa   : > { %s1339_s30 = smov %s1160_s11  ;;  %24 = sbr.rel (!%p22_p13) target bundleno = 8 (0x8), region = 175 }
 0x1b1   :  { %737 = vsyncpa [#allocation4], 1 }
 0x1b2   :  { %739 = vsyncpa [#allocation4 + $0x1], 1 }
 0x1b3   :  { %740 = vsyncpa [#allocation6], 1 }
 0x1b4   :  { %742 = vsyncpa [#allocation6 + $0x1], 1 }

</bundles_post_ra>
